<compile_context>
chip_gen: v7x
topology: tpu7x:2x2x1
jax: 0.10.0
libtpu: 0.0.40
codegen_flags: <defaults>
</compile_context>

<pallas_src>
from functools import partial

import jax
import jax.numpy as jnp
from jax.experimental import pallas as pl
from jax.experimental.pallas import tpu as pltpu


def _kernel(x_ref, w1t_ref, b1_ref, w2t_ref, b2_ref, o_ref):
    # x_ref block: (Nb, C, L); weights: w1t (C, H), b1 (1, H), w2t (H, C),
    # b2 (1, C).  Everything below the pooled stats is tiny (Nb x C).
    x = x_ref[...]                                    # native dtype, read once
    nb, _, l = x.shape                                # static block shape

    # --- pooled statistics, accumulated in f32 ------------------------------
    avg = jnp.sum(x, axis=2, dtype=jnp.float32) * (1.0 / l)      # (Nb, C)
    mx = jnp.max(x, axis=2).astype(jnp.float32)                  # (Nb, C)

    # --- shared 1x1-conv MLP: both pooled vectors of all samples at once ----
    pooled = jnp.concatenate([avg, mx], axis=0)       # (2*Nb, C)
    w1t = w1t_ref[...].astype(jnp.float32)            # (C, H)
    w2t = w2t_ref[...].astype(jnp.float32)            # (H, C)
    b1 = b1_ref[...].astype(jnp.float32)              # (1, H)
    b2 = b2_ref[...].astype(jnp.float32)              # (1, C)

    h = jnp.dot(pooled, w1t, preferred_element_type=jnp.float32) + b1   # (2Nb, H)
    h = jnp.maximum(h, 0.0)
    y = jnp.dot(h, w2t, preferred_element_type=jnp.float32) + b2        # (2Nb, C)

    # fc(avg) + fc(max): each fc adds its conv biases once, so the sum carries
    # 2*b2 — exactly like the PyTorch module (Conv1d bias=True on both calls).
    logits = y[:nb] + y[nb:]                          # (Nb, C)
    att = jax.nn.sigmoid(logits).astype(x.dtype)      # downcast gate only

    # Broadcast multiply in the input dtype (no extra f32 tile).
    o_ref[...] = att[:, :, None] * x


def _tensorcores_per_device():
    """Best-effort TensorCore count per device (for megacore grid sharding)."""
    try:
        kind = jax.devices()[0].device_kind.lower()
    except Exception:
        return 1
    # v4 / v5p expose a 2-TC megacore per device; v7x has 2 TCs per chip.
    if any(tag in kind for tag in ("v4", "v5p", "v7")):
        return 2
    return 1


@partial(jax.jit, static_argnames=("nb", "grid_steps"), donate_argnums=(0,))
def _channel_attention_call(x, w1t, b1_2d, w2t, b2_2d, *, nb, grid_steps):
    N, C, L = x.shape
    H = w1t.shape[1]
    return pl.pallas_call(
        _kernel,
        out_shape=jax.ShapeDtypeStruct((N, C, L), x.dtype),
        grid_spec=pltpu.PrefetchScalarGridSpec(
            num_scalar_prefetch=0,
            grid=(grid_steps,),
            in_specs=[
                pl.BlockSpec((nb, C, L), lambda b: (b, 0, 0)),
                pl.BlockSpec((C, H), lambda b: (0, 0)),
                pl.BlockSpec((1, H), lambda b: (0, 0)),
                pl.BlockSpec((H, C), lambda b: (0, 0)),
                pl.BlockSpec((1, C), lambda b: (0, 0)),
            ],
            out_specs=pl.BlockSpec((nb, C, L), lambda b: (b, 0, 0)),
        ),
        compiler_params=pltpu.CompilerParams(
            dimension_semantics=("parallel",),
            vmem_limit_bytes=48 * 1024 * 1024,   # safe on v5e/v6e (128 MiB) and v7x (64 MiB/TC)
        ),
        # Gate is computed entirely from the in-VMEM tile before writeback, so
        # the input tile can alias the output tile.  Effective because x is
        # donated at the jit boundary above.
        input_output_aliases={0: 0},
    )(x, w1t, b1_2d, w2t, b2_2d)


def channel_attention(x, w1, b1, w2, b2, *, max_block_bytes=8 * 1024 * 1024):
    """ChannelAttention forward. NOTE: x is donated (do not reuse it after)."""
    N, C, L = x.shape
    H = w1.shape[0]

    itemsize = jnp.dtype(x.dtype).itemsize
    per_batch_bytes = max(C * L * itemsize, 1)

    # Batch elements per grid step: biggest block within the byte cap.
    nb = max(1, min(N, max_block_bytes // per_batch_bytes))

    # Only split for multiple TensorCores on chips that actually have them.
    num_tc = _tensorcores_per_device()
    if num_tc > 1 and N >= num_tc:
        nb = min(nb, pl.cdiv(N, num_tc))          # every TC gets >= 1 grid step
    grid_steps = pl.cdiv(N, nb)                   # ragged last block is fine
    if num_tc > 1 and grid_steps > 1 and grid_steps % num_tc:
        # Nudge the step count towards a multiple of the TC count (even split).
        target = ((grid_steps + num_tc - 1) // num_tc) * num_tc
        nb = max(1, pl.cdiv(N, target))
        grid_steps = pl.cdiv(N, nb)

    # TODO(synk): for very large C*L per batch element (block far above a few
    # MiB even at nb=1), add an L-tiled two-pass path (grid axis over L marked
    # "arbitrary", sum/max accumulated in VMEM scratch with pl.when(l==0) init,
    # then a second pass for the sigmoid-gate multiply) so v7x's 64 MiB/TC VMEM
    # budget is respected.

    # Conv1d(kernel=1) weights as plain matrices, pre-transposed so kernel
    # matmuls are plain NN dots (no in-kernel transpose).
    w1_t = jnp.transpose(w1)            # (C, H)
    w2_t = jnp.transpose(w2)            # (H, C)
    b1_2d = b1.reshape(1, H)
    b2_2d = b2.reshape(1, C)

    return _channel_attention_call(x, w1_t, b1_2d, w2_t, b2_2d,
                                   nb=nb, grid_steps=grid_steps)


def channel_attention_ref(x, w1, b1, w2, b2):
    # Pure-JAX reference mirroring the PyTorch forward.
    avg = jnp.mean(x, axis=2, keepdims=True)                       # (N, C, 1)
    mx = jnp.max(x, axis=2, keepdims=True)                         # (N, C, 1)

    def fc(v):
        h = jnp.einsum("hc,ncl->nhl", w1, v) + b1[None, :, None]
        h = jnp.maximum(h, 0.0)
        return jnp.einsum("ch,nhl->ncl", w2, h) + b2[None, :, None]

    att = jax.nn.sigmoid(fc(avg) + fc(mx))
    return att * x


if __name__ == "__main__":
    # Shapes implied by the module: Conv1d inputs are (N, C, L); ratio=16
    # requires C divisible by 16.  L deliberately NOT a multiple of 128 and N
    # deliberately odd to exercise the unpadded / ragged-block paths.
    N, C, L = 3, 32, 100
    ratio = 16
    H = C // ratio

    key = jax.random.PRNGKey(0)
    kx, kw1, kb1, kw2, kb2 = jax.random.split(key, 5)

    x = jax.random.normal(kx, (N, C, L), dtype=jnp.float32)
    # Conv1d kernel_size=1 => (out, in) weight matrices.
    w1 = jax.random.normal(kw1, (H, C), dtype=jnp.float32) * 0.1
    b1 = jax.random.normal(kb1, (H,), dtype=jnp.float32) * 0.1
    w2 = jax.random.normal(kw2, (C, H), dtype=jnp.float32) * 0.1
    b2 = jax.random.normal(kb2, (C,), dtype=jnp.float32) * 0.1

    # Compute the reference FIRST: x is donated into the kernel call below.
    ref = channel_attention_ref(x, w1, b1, w2, b2)
    ref = jax.block_until_ready(ref)

    out = channel_attention(x, w1, b1, w2, b2)
    out = jax.block_until_ready(out)

    assert out.shape == (N, C, L)
    assert jnp.allclose(out, ref, atol=1e-5, rtol=1e-5), "mismatch vs reference"

    print("KERNEL_OK")
</pallas_src>

<mosaic_0001>
module attributes {stable_mosaic.version = 11 : i64} {
  func.func @_kernel(%arg0: i32, %arg1: memref<3x32x100xf32, #tpu.memory_space<vmem>>, %arg2: memref<32x2xf32, #tpu.memory_space<vmem>>, %arg3: memref<1x2xf32, #tpu.memory_space<vmem>>, %arg4: memref<2x32xf32, #tpu.memory_space<vmem>>, %arg5: memref<1x32xf32, #tpu.memory_space<vmem>>, %arg6: memref<3x32x100xf32, #tpu.memory_space<vmem>>) attributes {dimension_semantics = [#tpu.dimension_semantics<parallel>], iteration_bounds = array<i64: 1>, scalar_prefetch = 0 : i64, scratch_operands = 0 : i64, tpu.core_type = #tpu.core_type<tc>, window_params = [{transform_indices = @transform_0, window_bounds = array<i64: 3, 32, 100>}, {pipeline_mode = #tpu.pipeline_mode<synchronous>, transform_indices = @transform_1, window_bounds = array<i64: 32, 2>}, {pipeline_mode = #tpu.pipeline_mode<synchronous>, transform_indices = @transform_2, window_bounds = array<i64: 1, 2>}, {pipeline_mode = #tpu.pipeline_mode<synchronous>, transform_indices = @transform_3, window_bounds = array<i64: 2, 32>}, {pipeline_mode = #tpu.pipeline_mode<synchronous>, transform_indices = @transform_4, window_bounds = array<i64: 1, 32>}, {transform_indices = @transform_5, window_bounds = array<i64: 3, 32, 100>}]} {
    %c0 = arith.constant 0 : index
    %c0_0 = arith.constant 0 : index
    %c0_1 = arith.constant 0 : index
    %0 = vector.load %arg1[%c0, %c0_0, %c0_1] : memref<3x32x100xf32, #tpu.memory_space<vmem>>, vector<3x32x100xf32>
    %cst = arith.constant dense<0.000000e+00> : vector<3x32xf32>
    %1 = vector.multi_reduction <add>, %0, %cst [2] : vector<3x32x100xf32> to vector<3x32xf32>
    %cst_2 = arith.constant 0.00999999977 : f32
    %2 = vector.broadcast %cst_2 : f32 to vector<3x32xf32>
    %3 = arith.mulf %1, %2 : vector<3x32xf32>
    %cst_3 = arith.constant dense<0xFF800000> : vector<3x32xf32>
    %4 = vector.multi_reduction <maximumf>, %0, %cst_3 [2] : vector<3x32x100xf32> to vector<3x32xf32>
    %5 = tpu.concatenate %3, %4 in 0 : vector<3x32xf32>, vector<3x32xf32> -> vector<6x32xf32>
    %c0_4 = arith.constant 0 : index
    %c0_5 = arith.constant 0 : index
    %6 = vector.load %arg2[%c0_4, %c0_5] : memref<32x2xf32, #tpu.memory_space<vmem>>, vector<32x2xf32>
    %c0_6 = arith.constant 0 : index
    %c0_7 = arith.constant 0 : index
    %7 = vector.load %arg4[%c0_6, %c0_7] : memref<2x32xf32, #tpu.memory_space<vmem>>, vector<2x32xf32>
    %c0_8 = arith.constant 0 : index
    %c0_9 = arith.constant 0 : index
    %8 = vector.load %arg3[%c0_8, %c0_9] : memref<1x2xf32, #tpu.memory_space<vmem>>, vector<1x2xf32>
    %c0_10 = arith.constant 0 : index
    %c0_11 = arith.constant 0 : index
    %9 = vector.load %arg5[%c0_10, %c0_11] : memref<1x32xf32, #tpu.memory_space<vmem>>, vector<1x32xf32>
    %cst_12 = arith.constant dense<0.000000e+00> : vector<6x2xf32>
    %10 = tpu.matmul %5, %6, %cst_12 {dimension_numbers = #tpu.dot_dimension_numbers<[1], [0], [0], [1], [0, 0, 1, 1], [], []>} : vector<6x32xf32>, vector<32x2xf32>, vector<6x2xf32> -> vector<6x2xf32>
    %11 = vector.broadcast %8 : vector<1x2xf32> to vector<6x2xf32>
    %12 = arith.addf %10, %11 : vector<6x2xf32>
    %cst_13 = arith.constant 0.000000e+00 : f32
    %13 = vector.broadcast %cst_13 : f32 to vector<6x2xf32>
    %14 = arith.maximumf %12, %13 : vector<6x2xf32>
    %cst_14 = arith.constant dense<0.000000e+00> : vector<6x32xf32>
    %15 = tpu.matmul %14, %7, %cst_14 {dimension_numbers = #tpu.dot_dimension_numbers<[1], [0], [0], [1], [0, 0, 1, 1], [], []>} : vector<6x2xf32>, vector<2x32xf32>, vector<6x32xf32> -> vector<6x32xf32>
    %16 = vector.broadcast %9 : vector<1x32xf32> to vector<6x32xf32>
    %17 = arith.addf %15, %16 : vector<6x32xf32>
    %18 = vector.extract_strided_slice %17 {offsets = [0, 0], sizes = [3, 32], strides = [1, 1]} : vector<6x32xf32> to vector<3x32xf32>
    %19 = vector.extract_strided_slice %17 {offsets = [3, 0], sizes = [3, 32], strides = [1, 1]} : vector<6x32xf32> to vector<3x32xf32>
    %20 = arith.addf %18, %19 : vector<3x32xf32>
    %21 = arith.negf %20 : vector<3x32xf32>
    %22 = math.exp %21 : vector<3x32xf32>
    %cst_15 = arith.constant 1.000000e+00 : f32
    %23 = vector.broadcast %cst_15 : f32 to vector<3x32xf32>
    %24 = arith.addf %23, %22 : vector<3x32xf32>
    %25 = arith.divf %23, %24 : vector<3x32xf32>
    %26 = vector.shape_cast %25 : vector<3x32xf32> to vector<3x32x1xf32>
    %27 = vector.broadcast %26 : vector<3x32x1xf32> to vector<3x32x100xf32>
    %28 = arith.mulf %27, %0 : vector<3x32x100xf32>
    %c0_16 = arith.constant 0 : index
    %c0_17 = arith.constant 0 : index
    %c0_18 = arith.constant 0 : index
    %29 = vector.load %arg6[%c0_16, %c0_17, %c0_18] : memref<3x32x100xf32, #tpu.memory_space<vmem>>, vector<3x32x100xf32>
    tpu.vector_store %arg6[%c0_16, %c0_17, %c0_18], %28 {strides = array<i32>} : memref<3x32x100xf32, #tpu.memory_space<vmem>>, vector<3x32x100xf32>,
    return
  }
  func.func @transform_0(%arg0: i32) -> (i32, i32, i32) {
    %c0_i32 = arith.constant 0 : i32
    %c0_i32_0 = arith.constant 0 : i32
    %c0_i32_1 = arith.constant 0 : i32
    return %arg0, %c0_i32, %c0_i32_0 : i32, i32, i32
  }
  func.func @transform_1(%arg0: i32) -> (i32, i32) {
    %c0_i32 = arith.constant 0 : i32
    %c0_i32_0 = arith.constant 0 : i32
    %c0_i32_1 = arith.constant 0 : i32
    return %c0_i32, %c0_i32_0 : i32, i32
  }
  func.func @transform_2(%arg0: i32) -> (i32, i32) {
    %c0_i32 = arith.constant 0 : i32
    %c0_i32_0 = arith.constant 0 : i32
    %c0_i32_1 = arith.constant 0 : i32
    return %c0_i32, %c0_i32_0 : i32, i32
  }
  func.func @transform_3(%arg0: i32) -> (i32, i32) {
    %c0_i32 = arith.constant 0 : i32
    %c0_i32_0 = arith.constant 0 : i32
    %c0_i32_1 = arith.constant 0 : i32
    return %c0_i32, %c0_i32_0 : i32, i32
  }
  func.func @transform_4(%arg0: i32) -> (i32, i32) {
    %c0_i32 = arith.constant 0 : i32
    %c0_i32_0 = arith.constant 0 : i32
    %c0_i32_1 = arith.constant 0 : i32
    return %c0_i32, %c0_i32_0 : i32, i32
  }
  func.func @transform_5(%arg0: i32) -> (i32, i32, i32) {
    %c0_i32 = arith.constant 0 : i32
    %c0_i32_0 = arith.constant 0 : i32
    %c0_i32_1 = arith.constant 0 : i32
    return %arg0, %c0_i32, %c0_i32_0 : i32, i32, i32
  }
}

</mosaic_0001>

<bundles_post_ra>
// kernel: _channel_attention_call.1
= control target key start
LH: loop header
LB: loop body
LE: loop exit
PB: predicated region body
PF: predicated region fallthrough
CT: control target
= control target key end

     0   :  { %10 = vsyncpa [#allocation3], 0  ;;  %s910_s0 = inlined_call_operand.hbm [shape: f32[3,32,100], index: 0, kind: input, shape index: {}, may-alias: {0,5}]   ;;  %s911_s1 = inlined_call_operand.vmem [shape: f32[32,2], index: 1, kind: input, shape index: {}]   ;;  %s912_s2 = inlined_call_operand.vmem [shape: f32[1,2], index: 2, kind: input, shape index: {}]   ;;  %s913_s3 = inlined_call_operand.vmem [shape: f32[2,32], index: 3, kind: input, shape index: {}]   ;;  %s914_s4 = inlined_call_operand.vmem [shape: f32[1,32], index: 4, kind: input, shape index: {}]   ;;  %s915_s5 = inlined_call_operand.hbm [shape: f32[3,32,100], index: 5, kind: output, shape index: {}, may-alias: {0,5}]  }
   0x1   :  { %11 = vsyncpa [#allocation4], 0  ;;  %s664_s18 = smov [#allocation2]   ;;  %s616_s22 = scalar_lea.hbm %s910_s0, 1536 }
   0x2   :  { %s17_s19 = sshll.u32 %s664_s18, 4  ;;  %p617_p0 = scmp.ne.s32.totalorder %s910_s0, %s616_s22  ;;  %s18_s19 = int_to_ptr.vmem [resolvable:$true] %s17_s19 }
   0x3   :  { %p620_p1 = scmp.lt.u32.totalorder %s616_s22, %s910_s0 }
   0x5   :  { %p622_p2 = pnand %p620_p1, %p617_p0 }
   0x7   :  { %625 = shalt.err (!%p622_p2)
}
   0x8   :  { %s626_s27 = scalar_lea.vmem %s18_s19, 1536  ;;  %p631_p4 = scmp.lt.s32.totalorder %s18_s19, %s18_s19 }
   0x9   :  { %p627_p3 = scmp.ne.s32.totalorder %s18_s19, %s626_s27  ;;  %p632_p5 = scmp.lt.s32.totalorder %s626_s27, %s626_s27 }
   0xb   :  { %p633_p6 = por %p632_p5, %p631_p4 }
   0xd   :  { %p634_p7 = pnand %p633_p6, %p627_p3 }
   0xf   :  { %637 = shalt.err (!%p634_p7)
}
  0x10   :  { %s665_s28 = smov 128   ;;  %s666_s29 = smov 8  }
  0x11   :  { %23 = dma.hbm_to_vmem [thread:$0]  %s910_s0, 1536, %s18_s19, [#allocation3], %s665_s28, %s665_s28, %s666_s29  }
  0x12   :  { %660 = dma.done.wait [#allocation3], 1536  }
  0x13   :  { %661 = vsyncadd [#allocation3], 4294965760  ;;  %vm47_vm0 = vcmask 818176   ;;  %v716_v0 = vld [vmem:[#allocation2 + $0x20] sm:$0xff]  ;;  %v720_v2 = vld [vmem:[#allocation2 + $0x28] sm:$0xff]  ;;  %v667_v39 = vmov 0.0|0.0   ;;  %v144_v54 = vlaneseq }
  0x14   :  { %v718_v1 = vld [vmem:[#allocation2] sm:$0xff]  ;;  %v60_v3 = vsel %vm47_vm0, %v716_v0, 0.0  ;;  %v726_v5 = vld [vmem:[#allocation2 + $0x8] sm:$0xff]  ;;  %v63_v6 = vsel %vm47_vm0, %v720_v2, 0.0  ;;  %v732_v8 = vld [vmem:[#allocation2 + $0x30] sm:$0xff]  ;;  %v108_v23 = vsel %vm47_vm0, %v716_v0, -inf  ;;  %599 = vmatprep.subr.bf16.mxu0 %v667_v39 }
  0x15   :  { %v48_v4 = vsel %vm47_vm0, %v718_v1, 0.0  ;;  %61 = vadd.xlane.f32.xlu1 %v60_v3  ;;  %v51_v7 = vsel %vm47_vm0, %v726_v5, 0.0  ;;  %v734_v9 = vld [vmem:[#allocation2 + $0x10] sm:$0xff]  ;;  %v66_v10 = vsel %vm47_vm0, %v732_v8, 0.0  ;;  %v740_v12 = vld [vmem:[#allocation2 + $0x48] sm:$0xff]  ;;  %v742_v13 = vld [vmem:[#allocation2 + $0x40] sm:$0xff] }
  0x16   :  { %49 = vadd.xlane.f32.xlu0 %v48_v4  ;;  %v54_v11 = vsel %vm47_vm0, %v734_v9, 0.0  ;;  %v75_v14 = vsel %vm47_vm0, %v740_v12, 0.0  ;;  %v72_v15 = vsel %vm47_vm0, %v742_v13, 0.0  ;;  %v748_v16 = vld [vmem:[#allocation2 + $0x38] sm:$0xff]  ;;  %v756_v20 = vld [vmem:[#allocation2 + $0x50] sm:$0xff]  ;;  %v96_v21 = vsel %vm47_vm0, %v718_v1, -inf }
  0x17   :  { %v750_v17 = vld [vmem:[#allocation2 + $0x18] sm:$0xff]  ;;  %v69_v18 = vsel %vm47_vm0, %v748_v16, 0.0  ;;  %v78_v22 = vsel %vm47_vm0, %v756_v20, 0.0  ;;  %v99_v24 = vsel %vm47_vm0, %v726_v5, -inf  ;;  %v111_v27 = vsel %vm47_vm0, %v720_v2, -inf  ;;  %v290_v36 = vld [vmem:[%s911_s1] sm:$0xff] }
  0x18   :  { %v57_v19 = vsel %vm47_vm0, %v750_v17, 0.0  ;;  %v766_v25 = vld [vmem:[#allocation2 + $0x58] sm:$0xff]  ;;  %v114_v28 = vsel %vm47_vm0, %v732_v8, -inf  ;;  %v102_v29 = vsel %vm47_vm0, %v734_v9, -inf  ;;  %v123_v30 = vsel %vm47_vm0, %v740_v12, -inf  ;;  %v291_v37 = vld [vmem:[%s911_s1 + $0x8] sm:$0xff] }
  0x19   :  { %64 = vadd.xlane.f32.xlu1 %v63_v6  ;;  %v81_v26 = vsel %vm47_vm0, %v766_v25, 0.0  ;;  %v120_v31 = vsel %vm47_vm0, %v742_v13, -inf  ;;  %v117_v32 = vsel %vm47_vm0, %v748_v16, -inf  ;;  %v105_v33 = vsel %vm47_vm0, %v750_v17, -inf  ;;  %v292_v40 = vld [vmem:[%s911_s1 + $0x10] sm:$0xff]  ;;  %v293_v41 = vld [vmem:[%s911_s1 + $0x18] sm:$0xff] }
  0x1a   :  { %52 = vadd.xlane.f32.xlu0 %v51_v7  ;;  %v126_v34 = vsel %vm47_vm0, %v756_v20, -inf  ;;  %v129_v35 = vsel %vm47_vm0, %v766_v25, -inf  ;;  %v600_v38 = vpack.c.bf16 %v291_v37, %v290_v36  ;;  %v603_v42 = vpack.c.bf16 %v293_v41, %v292_v40 }
  0x1b   :  { %vm668_vm1 = vmmov 0   ;;  %v669_v43 = vmov 0.0   ;;  %v145_v57 = vand.u32 127, %v144_v54  ;;  %v806_v62 = vshrl.u32 %v144_v54, 7 }
  0x1c   :  { %601 = vmatpush3.bf16.msra.mxu0 %v600_v38  ;;  %591 = vmatprep.mubr.msk.f32.mxu0 %vm668_vm1, %v669_v43  ;;  %vm155_vm2 = vcmask 130112   ;;  %vm162_vm3 = vcmask 195712   ;;  %vm169_vm4 = vcmask 261312   ;;  %vm283_vm5 = vcmask 1044484  }
  0x1d   :  { %67 = vadd.xlane.f32.xlu1 %v66_v10  ;;  %602 = vmatprep.subr.bf16.mxu0 %v667_v39  ;;  %v150_v60 = vadd.s32 4294967288, %v145_v57  ;;  %v157_v61 = vadd.s32 4294967280, %v145_v57  ;;  %vm209_vm6 = vcmask 1041409   ;;  %vm211_vm7 = vcmask 1042434  }
  0x1e   :  { %55 = vadd.xlane.f32.xlu0 %v54_v11  ;;  %594 = vmatprep.subr.mxu1 %v669_v43  ;;  %vm285_vm8 = vcmask 1045509   ;;  %vm288_vm9 = vcmask 1042432   ;;  %vm303_vm10 = vcmask 261120   ;;  %vm388_vm11 = vcmask 1041408  }
  0x1f   :  { %596 = vmatprep.mubr.msk.f32.mxu1 %vm668_vm1, %v669_v43  ;;  %v809_v4 = vsub.s32 %v150_v60, %v806_v62  ;;  %v812_v10 = vsub.s32 %v157_v61, %v806_v62  ;;  %vm384_vm12 = vcmask 15360  }
  0x20   :  { %604 = vmatpush3.bf16.msra.mxu0 %v603_v42 }
  0x21   :  { %76 = vadd.xlane.f32.xlu1 %v75_v14  ;;  %v164_v14 = vadd.s32 4294967272, %v145_v57 }
  0x22   :  { %73 = vadd.xlane.f32.xlu0 %v72_v15  ;;  %v815_v15 = vsub.s32 %v145_v57, %v806_v62 }
  0x25   :  { %70 = vadd.xlane.f32.xlu1 %v69_v18 }
  0x26   :  { %58 = vadd.xlane.f32.xlu0 %v57_v19 }
  0x29   :  { %97 = vmax.xlane.f32.xlu1 %v96_v21 }
  0x2a   :  { %79 = vadd.xlane.f32.xlu0 %v78_v22 }
  0x2d   :  { %109 = vmax.xlane.f32.xlu1 %v108_v23 }
  0x2e   :  { %100 = vmax.xlane.f32.xlu0 %v99_v24 }
  0x31   :  { %82 = vadd.xlane.f32.xlu1 %v81_v26 }
  0x32   :  { %112 = vmax.xlane.f32.xlu0 %v111_v27 }
  0x35   :  { %115 = vmax.xlane.f32.xlu1 %v114_v28 }
  0x36   :  { %103 = vmax.xlane.f32.xlu0 %v102_v29  ;;  %v167_v29 = vsub.s32 %v164_v14, %v806_v62 }
  0x39   :  { %124 = vmax.xlane.f32.xlu1 %v123_v30 }
  0x3a   :  { %121 = vmax.xlane.f32.xlu0 %v120_v31 }
  0x3d   :  { %118 = vmax.xlane.f32.xlu1 %v117_v32 }
  0x3e   :  { %106 = vmax.xlane.f32.xlu0 %v105_v33 }
  0x41   :  { %130 = vmax.xlane.f32.xlu1 %v129_v35 }
  0x42   :  { %127 = vmax.xlane.f32.xlu0 %v126_v34 }
  0xa2   :  { %v62_v44 = vpop.xlane.xlu1 %61 }
  0xa3   :  { %v50_v45 = vpop.xlane.xlu0 %49  ;;  %v88_v18 = vmul.f32 0.01, %v62_v44 }
  0xa4   :  { %v84_v19 = vmul.f32 0.01, %v50_v45 }
  0xa5   :  { %v174_v30 = vrot.slane %v88_v18, %v815_v15 }
  0xa6   :  { %v65_v46 = vpop.xlane.xlu1 %64  ;;  %v149_v31 = vrot.slane %v84_v19, %v815_v15 }
  0xa7   :  { %v53_v47 = vpop.xlane.xlu0 %52  ;;  %v89_v6 = vmul.f32 0.01, %v65_v46 }
  0xa8   :  { %v85_v7 = vmul.f32 0.01, %v53_v47 }
  0xa9   :  { %v178_v23 = vrot.slane %v89_v6, %v809_v4 }
  0xaa   :  { %v68_v48 = vpop.xlane.xlu1 %67  ;;  %v154_v24 = vrot.slane %v85_v7, %v809_v4 }
  0xab   :  { %v56_v49 = vpop.xlane.xlu0 %55  ;;  %v90_v11 = vmul.f32 0.01, %v68_v48  ;;  %v179_v38 = vsel %vm155_vm2, %v178_v23, %v174_v30 }
  0xac   :  { %v86_v27 = vmul.f32 0.01, %v56_v49  ;;  %v156_v39 = vsel %vm155_vm2, %v154_v24, %v149_v31 }
  0xad   :  { %v183_v26 = vrot.slane %v90_v11, %v812_v10 }
  0xae   :  { %v77_v50 = vpop.xlane.xlu1 %76  ;;  %v161_v41 = vrot.slane %v86_v27, %v812_v10 }
  0xaf   :  { %v74_v51 = vpop.xlane.xlu0 %73  ;;  %v93_v28 = vmul.f32 0.01, %v77_v50  ;;  %v184_v40 = vsel %vm162_vm3, %v183_v26, %v179_v38 }
  0xb0   :  { %v92_v32 = vmul.f32 0.01, %v74_v51 }
  0xb1   :  { %v197_v42 = vrot.slane %v93_v28, %v809_v4 }
  0xb2   :  { %v71_v52 = vpop.xlane.xlu1 %70  ;;  %v193_v44 = vrot.slane %v92_v32, %v815_v15 }
  0xb3   :  { %v59_v53 = vpop.xlane.xlu0 %58  ;;  %v91_v33 = vmul.f32 0.01, %v71_v52 }
  0xb4   :  { %v87_v34 = vmul.f32 0.01, %v59_v53  ;;  %v198_v6 = vsel %vm155_vm2, %v197_v42, %v193_v44 }
  0xb5   :  { %v188_v45 = vrot.slane %v91_v33, %v167_v29 }
  0xb6   :  { %v800_v55 = vpop.xlane.xlu1 %97  ;;  %v168_v48 = vrot.slane %v87_v34, %v167_v29 }
  0xb7   :  { %v80_v56 = vpop.xlane.xlu0 %79  ;;  %v229_v54 = vrot.slane %v800_v55, %v815_v15  ;;  %v189_v7 = vsel %vm169_vm4, %v188_v45, %v184_v40  ;;  %v572_v40 = vld [vmem:[%s914_s4] ss:$0 sm:$0xff] }
  0xb8   :  { %v94_v35 = vmul.f32 0.01, %v80_v56 }
  0xba   :  { %v802_v58 = vpop.xlane.xlu1 %109  ;;  %v202_v49 = vrot.slane %v94_v35, %v812_v10  ;;  %v570_v35 = vld [vmem:[%s912_s2] ss:$0 sm:$0xff]  ;;  %s670_s2 = smov [#allocation5]  }
  0xbb   :  { %v804_v59 = vpop.xlane.xlu0 %100  ;;  %v248_v56 = vrot.slane %v802_v58, %v815_v15 }
  0xbc   :  { %v233_v46 = vrot.slane %v804_v59, %v809_v4  ;;  %v163_v59 = vsel %vm162_vm3, %v161_v41, %v156_v39  ;;  %v203_v58 = vsel %vm162_vm3, %v202_v49, %v198_v6  ;;  %v474_v49 = vsub.s32 0, %v806_v62 }
  0xbd   :  { %v170_v14 = vsel %vm169_vm4, %v168_v48, %v163_v59 }
  0xbe   :  { %v83_v63 = vpop.xlane.xlu1 %82  ;;  %v234_v11 = vsel %vm155_vm2, %v233_v46, %v229_v54  ;;  %v210_v32 = vsel %vm209_vm6, %v189_v7, %v170_v14  ;;  %v512_v54 = vsub.s32 2, %v806_v62 }
  0xbf   :  { %v113_v3 = vpop.xlane.xlu0 %112  ;;  %v95_v43 = vmul.f32 0.01, %v83_v63 }
  0xc0   :  { %v252_v47 = vrot.slane %v113_v3, %v809_v4 }
  0xc1   :  { %v207_v61 = vrot.slane %v95_v43, %v167_v29 }
  0xc2   :  { %v116_v21 = vpop.xlane.xlu1 %115  ;;  %v253_v55 = vsel %vm155_vm2, %v252_v47, %v248_v56 }
  0xc3   :  { %v104_v22 = vpop.xlane.xlu0 %103  ;;  %v257_v50 = vrot.slane %v116_v21, %v812_v10  ;;  %v208_v26 = vsel %vm169_vm4, %v207_v61, %v203_v58 }
  0xc4   :  { %v238_v51 = vrot.slane %v104_v22, %v812_v10  ;;  %v212_v33 = vsel %vm211_vm7, %v208_v26, %v210_v32 }
  0xc5   :  { %v258_v18 = vsel %vm162_vm3, %v257_v50, %v253_v55 }
  0xc6   :  { %v125_v36 = vpop.xlane.xlu1 %124  ;;  %v239_v19 = vsel %vm162_vm3, %v238_v51, %v234_v11 }
  0xc7   :  { %v122_v37 = vpop.xlane.xlu0 %121  ;;  %v271_v63 = vrot.slane %v125_v36, %v809_v4 }
  0xc8   :  { %v267_v3 = vrot.slane %v122_v37, %v815_v15 }
  0xca   :  { %v119_v52 = vpop.xlane.xlu1 %118  ;;  %v272_v27 = vsel %vm155_vm2, %v271_v63, %v267_v3 }
  0xcb   :  { %v107_v53 = vpop.xlane.xlu0 %106  ;;  %v262_v57 = vrot.slane %v119_v52, %v167_v29  ;;  %v493_v52 = vsub.s32 1, %v806_v62 }
  0xcc   :  { %v243_v60 = vrot.slane %v107_v53, %v167_v29 }
  0xcd   :  { %v263_v15 = vsel %vm169_vm4, %v262_v57, %v258_v18 }
  0xce   :  { %v131_v4 = vpop.xlane.xlu1 %130  ;;  %v244_v22 = vsel %vm169_vm4, %v243_v60, %v239_v19 }
  0xcf   :  { %v128_v21 = vpop.xlane.xlu0 %127  ;;  %v281_v24 = vrot.slane %v131_v4, %v167_v29  ;;  %v284_v30 = vsel %vm283_vm5, %v263_v15, %v244_v22  ;;  %v294_v29 = vld [vmem:[%s913_s3] sm:$0x3]  ;;  %s558_s3 = sshll.u32 %s670_s2, 4  ;;  %s559_s3 = int_to_ptr.vmem [resolvable:$true] %s558_s3 }
  0xd0   :  { %v276_v23 = vrot.slane %v128_v21, %v812_v10  ;;  %595 = vmatpush3.msk.msra.mxu1 %vm388_vm11, %v294_v29  ;;  %s638_s4 = scalar_lea.vmem %s559_s3, 1536  ;;  %p643_p9 = scmp.lt.s32.totalorder %s559_s3, %s559_s3 }
  0xd1   :  { %p639_p8 = scmp.ne.s32.totalorder %s559_s3, %s638_s4  ;;  %p644_p10 = scmp.lt.s32.totalorder %s638_s4, %s638_s4 }
  0xd2   :  { %v277_v28 = vsel %vm162_vm3, %v276_v23, %v272_v27 }
  0xd3   :  { %v282_v31 = vsel %vm169_vm4, %v281_v24, %v277_v28  ;;  %p645_p11 = por %p644_p10, %p643_p9 }
  0xd4   :  { %v286_v34 = vsel %vm285_vm8, %v282_v31, %v284_v30 }
  0xd5   :  { %v289_v10 = vsel %vm288_vm9, %v212_v33, %v286_v34  ;;  %p646_p12 = pnand %p645_p11, %p639_p8 }
  0xd6   :  { %592 = vmatmul.mubr.msk.f32.vlgmr.msra.gmra.mrb[0].mxu0 %vm303_vm10, %v289_v10 }
 0x1a9   :  { %v373_v36 = vpop.f32.mrb[0].mxu0 }
 0x1aa   :  { %v374_v37 = vadd.f32 %v570_v35, %v373_v36  ;;  %v593_v38 = vpop.f32.mrb[1].mxu0 }
 0x1ac   :  { %v377_v39 = vmax.f32 %v374_v37, 0.0 }
 0x1ae   :  { %597 = vmatmul.mubr.msk.f32.vlgmr.msra.gmra.mrb[0].mxu1 %vm384_vm12, %v377_v39 }
 0x281   :  { %v458_v41 = vpop.f32.mrb[0].mxu1 }
 0x282   :  { %v459_v42 = vadd.f32 %v572_v40, %v458_v41  ;;  %v598_v43 = vpop.f32.mrb[1].mxu1 }
 0x284   :  { %v463_v44 = vrot.slane %v459_v42, 3 }
 0x286   :  { %v465_v45 = vadd.f32 %v463_v44, %v459_v42 }
 0x288   :  { %v575_v46 = vmul.f32 -1.442695, %v465_v45 }
 0x28a   :  { %612 = vpow2.f32 %v575_v46 }
 0x294   :  { %v613_v47 = vpop.eup %612 }
 0x295   :  { %v469_v48 = vadd.f32 1.0, %v613_v47 }
 0x297   :  { %614 = vrcp.f32 %v469_v48 }
 0x2a1   :  { %v615_v50 = vpop.eup %614 }
 0x2a2   :  { %v475_v51 = vrot.slane %v615_v50, %v474_v49  ;;  %v494_v53 = vrot.slane %v615_v50, %v493_v52  ;;  %v513_v56 = vrot.slane %v615_v50, %v512_v54 }
 0x2a4   :  { %481 = vbcast.lane.b32.xlu1 %v475_v51, 264  ;;  %477 = vbcast.lane.b32.xlu0 %v475_v51, 256 }
 0x2a8   :  { %485 = vbcast.lane.b32.xlu1 %v475_v51, 272  ;;  %496 = vbcast.lane.b32.xlu0 %v494_v53, 256 }
 0x2ac   :  { %489 = vbcast.lane.b32.xlu1 %v475_v51, 280  ;;  %504 = vbcast.lane.b32.xlu0 %v494_v53, 272 }
 0x2b0   :  { %500 = vbcast.lane.b32.xlu1 %v494_v53, 264  ;;  %515 = vbcast.lane.b32.xlu0 %v513_v56, 256 }
 0x2b4   :  { %508 = vbcast.lane.b32.xlu1 %v494_v53, 280  ;;  %523 = vbcast.lane.b32.xlu0 %v513_v56, 272 }
 0x2b8   :  { %519 = vbcast.lane.b32.xlu1 %v513_v56, 264 }
 0x2bc   :  { %527 = vbcast.lane.b32.xlu1 %v513_v56, 280 }
 0x316   :  { %v482_v57 = vpop.permute.xlu1 %481  ;;  %v478_v60 = vpop.permute.xlu0 %477 }
 0x317   :  { %v530_v59 = vmul.f32 %v482_v57, %v726_v5  ;;  %v529_v61 = vmul.f32 %v478_v60, %v718_v1 }
 0x319   :  { %542 = vst.msk [vmem:[#allocation5 + $0x8] sm:$0xff] %vm47_vm0, %v530_v59  ;;  %541 = vst.msk [vmem:[#allocation5] sm:$0xff] %vm47_vm0, %v529_v61 }
 0x31a   :  { %v486_v62 = vpop.permute.xlu1 %485  ;;  %v497_v63 = vpop.permute.xlu0 %496 }
 0x31b   :  { %v531_v3 = vmul.f32 %v486_v62, %v734_v9  ;;  %v533_v6 = vmul.f32 %v497_v63, %v716_v0 }
 0x31d   :  { %543 = vst.msk [vmem:[#allocation5 + $0x10] sm:$0xff] %vm47_vm0, %v531_v3  ;;  %545 = vst.msk [vmem:[#allocation5 + $0x20] sm:$0xff] %vm47_vm0, %v533_v6 }
 0x31e   :  { %v490_v7 = vpop.permute.xlu1 %489  ;;  %v505_v11 = vpop.permute.xlu0 %504 }
 0x31f   :  { %v532_v5 = vmul.f32 %v490_v7, %v750_v17  ;;  %v535_v1 = vmul.f32 %v505_v11, %v732_v8 }
 0x321   :  { %544 = vst.msk [vmem:[#allocation5 + $0x18] sm:$0xff] %vm47_vm0, %v532_v5  ;;  %547 = vst.msk [vmem:[#allocation5 + $0x30] sm:$0xff] %vm47_vm0, %v535_v1 }
 0x322   :  { %v501_v55 = vpop.permute.xlu1 %500  ;;  %v516_v14 = vpop.permute.xlu0 %515 }
 0x323   :  { %v534_v9 = vmul.f32 %v501_v55, %v720_v2  ;;  %v537_v0 = vmul.f32 %v516_v14, %v742_v13 }
 0x325   :  { %546 = vst.msk [vmem:[#allocation5 + $0x28] sm:$0xff] %vm47_vm0, %v534_v9  ;;  %549 = vst.msk [vmem:[#allocation5 + $0x40] sm:$0xff] %vm47_vm0, %v537_v0 }
 0x326   :  { %v509_v58 = vpop.permute.xlu1 %508  ;;  %v524_v18 = vpop.permute.xlu0 %523 }
 0x327   :  { %v536_v17 = vmul.f32 %v509_v58, %v748_v16  ;;  %v539_v8 = vmul.f32 %v524_v18, %v756_v20 }
 0x329   :  { %548 = vst.msk [vmem:[#allocation5 + $0x38] sm:$0xff] %vm47_vm0, %v536_v17  ;;  %551 = vst.msk [vmem:[#allocation5 + $0x50] sm:$0xff] %vm47_vm0, %v539_v8 }
 0x32a   :  { %v520_v19 = vpop.permute.xlu1 %519 }
 0x32b   :  { %v538_v21 = vmul.f32 %v520_v19, %v740_v12 }
 0x32d   :  { %550 = vst.msk [vmem:[#allocation5 + $0x48] sm:$0xff] %vm47_vm0, %v538_v21 }
 0x32e   :  { %v528_v2 = vpop.permute.xlu1 %527 }
 0x32f   :  { %v540_v13 = vmul.f32 %v528_v2, %v766_v25 }
 0x331   :  { %552 = vst.msk [vmem:[#allocation5 + $0x58] sm:$0xff] %vm47_vm0, %v540_v13 }
 0x332   :  { %649 = shalt.err (!%p646_p12)
}
 0x333   :  { %s650_s21 = scalar_lea.hbm %s915_s5, 1536 }
 0x334   :  { %p651_p13 = scmp.ne.s32.totalorder %s915_s5, %s650_s21  ;;  %p654_p0 = scmp.lt.u32.totalorder %s650_s21, %s915_s5 }
 0x336   :  { %p656_p1 = pnand %p654_p0, %p651_p13 }
 0x338   :  { %659 = shalt.err (!%p656_p1)
}
 0x339   :  { %564 = dma.vmem_to_hbm [thread:$0]  %s559_s3, 1536, %s915_s5, [#allocation4], %s665_s28, %s665_s28, %s666_s29  }
 0x33a   :  { %662 = dma.done.wait [#allocation4], 1536  }
 0x33b   :  { %663 = vsyncadd [#allocation4], 4294965760 }
 0x33c   :  { %568 = vsyncpa [#allocation3], 1 }
 0x33d   :  { %569 = vsyncpa [#allocation4], 1 }

</bundles_post_ra>
